<compile_context>
chip_gen: v7x
topology: tpu7x:2x2x1
jax: 0.10.0
libtpu: 0.0.40
codegen_flags: <defaults>
</compile_context>

<pallas_src>
import functools

import jax
import jax.numpy as jnp
from jax.experimental import pallas as pl
from jax.experimental.pallas import tpu as pltpu


def _swish(x):
    return x * jax.nn.sigmoid(x)


def _round_up(x, m):
    return (x + m - 1) // m * m


def critic_kernel(sa_ref,
                  wblk_ref, bblk_ref,
                  ws2_ref, bs2_ref,
                  w2s_ref, w2a_ref, b2_ref,
                  w3_ref, b3_ref,
                  out_ref,
                  *, act_dtype):
    f32 = jnp.float32
    bf16 = jnp.bfloat16

    sa = sa_ref[...].astype(bf16)                      # [tb, sd+ad]

    # Fused first layer: h = swish([state|action] @ blockdiag(Ws1, Wa1) + b)
    h = jnp.dot(sa, wblk_ref[...], preferred_element_type=f32) + bblk_ref[...]
    h = _swish(h.astype(act_dtype))                    # [tb, 384]
    s1 = h[:, :256]                                    # lane-aligned slices
    a1 = h[:, 256:384]

    # s2 = swish(s1 @ Ws2 + bs2)                       -> [tb, 128]
    s2 = jnp.dot(s1.astype(bf16), ws2_ref[...],
                 preferred_element_type=f32) + bs2_ref[...]
    s2 = _swish(s2.astype(act_dtype))

    # x = swish(concat([s2, a1]) @ W2 + b2) without the concat:
    #   = swish(s2 @ W2_s + a1 @ W2_a + b2)            -> [tb, 128]
    x = (jnp.dot(s2.astype(bf16), w2s_ref[...], preferred_element_type=f32)
         + jnp.dot(a1.astype(bf16), w2a_ref[...], preferred_element_type=f32)
         + b2_ref[...])
    x = _swish(x.astype(act_dtype))

    # q = x @ W3 + b3 as a VPU mul + lane reduce (avoid a 1-column MXU dot).
    q = jnp.sum(x.astype(f32) * w3_ref[...], axis=-1, keepdims=True) + b3_ref[0, 0]
    out_ref[...] = q.astype(out_ref.dtype)             # [tb, 1]


def _use_bf16_activations():
    try:
        kind = jax.devices()[0].device_kind.lower()
    except Exception:
        return True
    # v2/v3/v4/v5 have no bf16 VPU/EUP path; keep swish in f32 there.
    return not any(t in kind for t in ("v2", "v3", "v4", "v5"))


def critic_forward(state, action, params, *, block_batch=2048):
    """state: [n, state_dim], action: [n, action_dim] -> Q(s,a): [n, 1] (f32)."""
    n, state_dim = state.shape
    action_dim = action.shape[1]
    in_dim = state_dim + action_dim

    # Batch tile: big (2048 default) to amortize per-step overhead, rounded to
    # 256 for MXU row cadence; tiny batches get a single small tile.
    if n <= 128:
        tb = _round_up(n, 8)
    else:
        tb = min(_round_up(block_batch, 256), _round_up(n, 256))
    n_pad = _round_up(n, tb)

    # Fuse state/action into one lane-dense input stream for the block-diag dot.
    sa = jnp.concatenate([state, action], axis=1)       # [n, sd+ad]
    if n_pad != n:
        sa = jnp.pad(sa, ((0, n_pad - n), (0, 0)))

    def resident(shape):  # weight/bias block: whole array, VMEM-resident
        return pl.BlockSpec(shape, lambda i: (0, 0))

    in_specs = [
        pl.BlockSpec((tb, in_dim), lambda i: (i, 0)),   # [state|action]
        resident((in_dim, 384)),     # block-diag first-layer weight (bf16)
        resident((1, 384)),          # [bs1 | ba1]
        resident((256, 128)),        # ws2 (bf16)
        resident((1, 128)),          # bs2
        resident((128, 128)),        # w2_s (bf16)
        resident((128, 128)),        # w2_a (bf16)
        resident((1, 128)),          # b2
        resident((1, 128)),          # w3 (f32 row)
        pl.BlockSpec(memory_space=pltpu.MemorySpace.SMEM),  # b3 (1,1) scalar
    ]

    grid_spec = pltpu.PrefetchScalarGridSpec(
        num_scalar_prefetch=0,
        grid=(n_pad // tb,),
        in_specs=in_specs,
        out_specs=pl.BlockSpec((tb, 1), lambda i: (i, 0)),
    )

    act_dtype = jnp.bfloat16 if _use_bf16_activations() else jnp.float32
    kernel = functools.partial(critic_kernel, act_dtype=act_dtype)

    out = pl.pallas_call(
        kernel,
        out_shape=jax.ShapeDtypeStruct((n_pad, 1), jnp.float32),
        grid_spec=grid_spec,
        compiler_params=pltpu.CompilerParams(
            dimension_semantics=("parallel",),
            vmem_limit_bytes=32 * 1024 * 1024),
    )(
        sa,
        params["wblk"], params["bblk"],
        params["ws2"], params["bs2"],
        params["w2_s"], params["w2_a"], params["b2"],
        params["w3"], params["b3"],
    )
    return out[:n]


def init_critic_params(key, state_dim, action_dim):
    """Mirror the PyTorch init: weights ~ U(-0.1, 0.1), biases ~ U(0.1, 1.0).
       Weights stored transposed ([in, out]); matmul weights cast to bf16.
       First-layer weights packed block-diagonally: [[Ws1, 0], [0, Wa1]]."""
    ks = jax.random.split(key, 10)

    def w(k, in_dim, out_dim):
        return jax.random.uniform(k, (in_dim, out_dim), jnp.float32, -0.1, 0.1)

    def b(k, out_dim):
        return jax.random.uniform(k, (1, out_dim), jnp.float32, 0.1, 1.0)

    ws1 = w(ks[0], state_dim, 256)
    wa1 = w(ks[4], action_dim, 128)
    wblk = jnp.zeros((state_dim + action_dim, 384), jnp.float32)
    wblk = wblk.at[:state_dim, :256].set(ws1)
    wblk = wblk.at[state_dim:, 256:].set(wa1)
    bblk = jnp.concatenate([b(ks[1], 256), b(ks[5], 128)], axis=1)  # [1, 384]

    w2 = w(ks[6], 256, 128)
    return {
        "wblk": wblk.astype(jnp.bfloat16),
        "bblk": bblk,
        "ws2": w(ks[2], 256, 128).astype(jnp.bfloat16),
        "bs2": b(ks[3], 128),
        "w2_s": w2[:128].astype(jnp.bfloat16),
        "w2_a": w2[128:].astype(jnp.bfloat16),
        "b2": b(ks[7], 128),
        "w3": w(ks[8], 1, 128),                 # kept f32, used on the VPU
        "b3": jax.random.uniform(ks[9], (1, 1), jnp.float32, 0.1, 1.0),
    }


def critic_reference(state, action, params):
    """Pure-JAX f32 reference of the same forward pass (weights upcast)."""
    sd = state.shape[1]
    f32 = lambda a: a.astype(jnp.float32)
    wblk = f32(params["wblk"])
    bblk = params["bblk"]
    s1 = _swish(state @ wblk[:sd, :256] + bblk[:, :256])
    a1 = _swish(action @ wblk[sd:, 256:] + bblk[:, 256:])
    s2 = _swish(s1 @ f32(params["ws2"]) + params["bs2"])
    x = jnp.concatenate([s2, a1], axis=-1)
    w2 = jnp.concatenate([f32(params["w2_s"]), f32(params["w2_a"])], axis=0)
    x = _swish(x @ w2 + params["b2"])
    return jnp.sum(x * params["w3"], axis=-1, keepdims=True) + params["b3"]


if __name__ == "__main__":
    state_dim, action_dim, batch = 32, 8, 8

    key = jax.random.PRNGKey(0)
    k_params, k_state, k_action = jax.random.split(key, 3)

    params = init_critic_params(k_params, state_dim, action_dim)
    state = jax.random.normal(k_state, (batch, state_dim), jnp.float32)
    action = jax.random.normal(k_action, (batch, action_dim), jnp.float32)

    # Small-batch latency case (single grid step, 8-row tile).
    q = jax.block_until_ready(critic_forward(state, action, params))
    q_ref = critic_reference(state, action, params)
    assert q.shape == (batch, 1)
    assert jnp.allclose(q, q_ref, rtol=2e-2, atol=3e-2), "mismatch (small batch)"

    # Larger, non-tile-multiple batch: exercises batch padding + a 2-step grid.
    n_big = 300
    k_s2, k_a2 = jax.random.split(jax.random.PRNGKey(1))
    state_b = jax.random.normal(k_s2, (n_big, state_dim), jnp.float32)
    action_b = jax.random.normal(k_a2, (n_big, action_dim), jnp.float32)
    q_b = jax.block_until_ready(
        critic_forward(state_b, action_b, params, block_batch=256))
    q_b_ref = critic_reference(state_b, action_b, params)
    assert q_b.shape == (n_big, 1)
    assert jnp.allclose(q_b, q_b_ref, rtol=2e-2, atol=3e-2), "mismatch (grid)"

    print("KERNEL_OK")
</pallas_src>

<mosaic_0001>
module attributes {stable_mosaic.version = 11 : i64} {
  func.func @critic_kernel(%arg0: i32, %arg1: memref<8x40xf32, #tpu.memory_space<vmem>>, %arg2: memref<40x384xbf16, #tpu.memory_space<vmem>>, %arg3: memref<1x384xf32, #tpu.memory_space<vmem>>, %arg4: memref<256x128xbf16, #tpu.memory_space<vmem>>, %arg5: memref<1x128xf32, #tpu.memory_space<vmem>>, %arg6: memref<128x128xbf16, #tpu.memory_space<vmem>>, %arg7: memref<128x128xbf16, #tpu.memory_space<vmem>>, %arg8: memref<1x128xf32, #tpu.memory_space<vmem>>, %arg9: memref<1x128xf32, #tpu.memory_space<vmem>>, %arg10: memref<1x1xf32, #tpu.memory_space<smem>>, %arg11: memref<8x1xf32, #tpu.memory_space<vmem>>) attributes {dimension_semantics = [#tpu.dimension_semantics<parallel>], iteration_bounds = array<i64: 1>, scalar_prefetch = 0 : i64, scratch_operands = 0 : i64, tpu.core_type = #tpu.core_type<tc>, window_params = [{transform_indices = @transform_0, window_bounds = array<i64: 8, 40>}, {pipeline_mode = #tpu.pipeline_mode<synchronous>, transform_indices = @transform_1, window_bounds = array<i64: 40, 384>}, {pipeline_mode = #tpu.pipeline_mode<synchronous>, transform_indices = @transform_2, window_bounds = array<i64: 1, 384>}, {pipeline_mode = #tpu.pipeline_mode<synchronous>, transform_indices = @transform_3, window_bounds = array<i64: 256, 128>}, {pipeline_mode = #tpu.pipeline_mode<synchronous>, transform_indices = @transform_4, window_bounds = array<i64: 1, 128>}, {pipeline_mode = #tpu.pipeline_mode<synchronous>, transform_indices = @transform_5, window_bounds = array<i64: 128, 128>}, {pipeline_mode = #tpu.pipeline_mode<synchronous>, transform_indices = @transform_6, window_bounds = array<i64: 128, 128>}, {pipeline_mode = #tpu.pipeline_mode<synchronous>, transform_indices = @transform_7, window_bounds = array<i64: 1, 128>}, {pipeline_mode = #tpu.pipeline_mode<synchronous>, transform_indices = @transform_8, window_bounds = array<i64: 1, 128>}, {transform_indices = @transform_9, window_bounds = array<i64: 1, 1>}, {transform_indices = @transform_10, window_bounds = array<i64: 8, 1>}]} {
    %c0 = arith.constant 0 : index
    %c0_0 = arith.constant 0 : index
    %0 = vector.load %arg1[%c0, %c0_0] : memref<8x40xf32, #tpu.memory_space<vmem>>, vector<8x40xf32>
    %1 = arith.truncf %0 : vector<8x40xf32> to vector<8x40xbf16>
    %c0_1 = arith.constant 0 : index
    %c0_2 = arith.constant 0 : index
    %2 = vector.load %arg2[%c0_1, %c0_2] : memref<40x384xbf16, #tpu.memory_space<vmem>>, vector<40x384xbf16>
    %cst = arith.constant dense<0.000000e+00> : vector<8x384xf32>
    %3 = tpu.matmul %1, %2, %cst {dimension_numbers = #tpu.dot_dimension_numbers<[1], [0], [0], [1], [0, 0, 1, 1], [], []>} : vector<8x40xbf16>, vector<40x384xbf16>, vector<8x384xf32> -> vector<8x384xf32>
    %c0_3 = arith.constant 0 : index
    %c0_4 = arith.constant 0 : index
    %4 = vector.load %arg3[%c0_3, %c0_4] : memref<1x384xf32, #tpu.memory_space<vmem>>, vector<1x384xf32>
    %5 = vector.broadcast %4 : vector<1x384xf32> to vector<8x384xf32>
    %6 = arith.addf %3, %5 : vector<8x384xf32>
    %7 = arith.truncf %6 : vector<8x384xf32> to vector<8x384xbf16>
    %8 = arith.negf %7 : vector<8x384xbf16>
    %9 = math.exp %8 : vector<8x384xbf16>
    %cst_5 = arith.constant 1.000000e+00 : bf16
    %10 = vector.broadcast %cst_5 : bf16 to vector<8x384xbf16>
    %11 = arith.addf %10, %9 : vector<8x384xbf16>
    %12 = arith.divf %10, %11 : vector<8x384xbf16>
    %13 = arith.mulf %7, %12 : vector<8x384xbf16>
    %14 = vector.extract_strided_slice %13 {offsets = [0, 0], sizes = [8, 256], strides = [1, 1]} : vector<8x384xbf16> to vector<8x256xbf16>
    %15 = vector.extract_strided_slice %13 {offsets = [0, 256], sizes = [8, 128], strides = [1, 1]} : vector<8x384xbf16> to vector<8x128xbf16>
    %c0_6 = arith.constant 0 : index
    %c0_7 = arith.constant 0 : index
    %16 = vector.load %arg4[%c0_6, %c0_7] : memref<256x128xbf16, #tpu.memory_space<vmem>>, vector<256x128xbf16>
    %cst_8 = arith.constant dense<0.000000e+00> : vector<8x128xf32>
    %17 = tpu.matmul %14, %16, %cst_8 {dimension_numbers = #tpu.dot_dimension_numbers<[1], [0], [0], [1], [0, 0, 1, 1], [], []>} : vector<8x256xbf16>, vector<256x128xbf16>, vector<8x128xf32> -> vector<8x128xf32>
    %c0_9 = arith.constant 0 : index
    %c0_10 = arith.constant 0 : index
    %18 = vector.load %arg5[%c0_9, %c0_10] : memref<1x128xf32, #tpu.memory_space<vmem>>, vector<1x128xf32>
    %19 = vector.broadcast %18 : vector<1x128xf32> to vector<8x128xf32>
    %20 = arith.addf %17, %19 : vector<8x128xf32>
    %21 = arith.truncf %20 : vector<8x128xf32> to vector<8x128xbf16>
    %22 = arith.negf %21 : vector<8x128xbf16>
    %23 = math.exp %22 : vector<8x128xbf16>
    %cst_11 = arith.constant 1.000000e+00 : bf16
    %24 = vector.broadcast %cst_11 : bf16 to vector<8x128xbf16>
    %25 = arith.addf %24, %23 : vector<8x128xbf16>
    %26 = arith.divf %24, %25 : vector<8x128xbf16>
    %27 = arith.mulf %21, %26 : vector<8x128xbf16>
    %c0_12 = arith.constant 0 : index
    %c0_13 = arith.constant 0 : index
    %28 = vector.load %arg6[%c0_12, %c0_13] : memref<128x128xbf16, #tpu.memory_space<vmem>>, vector<128x128xbf16>
    %cst_14 = arith.constant dense<0.000000e+00> : vector<8x128xf32>
    %29 = tpu.matmul %27, %28, %cst_14 {dimension_numbers = #tpu.dot_dimension_numbers<[1], [0], [0], [1], [0, 0, 1, 1], [], []>} : vector<8x128xbf16>, vector<128x128xbf16>, vector<8x128xf32> -> vector<8x128xf32>
    %c0_15 = arith.constant 0 : index
    %c0_16 = arith.constant 0 : index
    %30 = vector.load %arg7[%c0_15, %c0_16] : memref<128x128xbf16, #tpu.memory_space<vmem>>, vector<128x128xbf16>
    %cst_17 = arith.constant dense<0.000000e+00> : vector<8x128xf32>
    %31 = tpu.matmul %15, %30, %cst_17 {dimension_numbers = #tpu.dot_dimension_numbers<[1], [0], [0], [1], [0, 0, 1, 1], [], []>} : vector<8x128xbf16>, vector<128x128xbf16>, vector<8x128xf32> -> vector<8x128xf32>
    %32 = arith.addf %29, %31 : vector<8x128xf32>
    %c0_18 = arith.constant 0 : index
    %c0_19 = arith.constant 0 : index
    %33 = vector.load %arg8[%c0_18, %c0_19] : memref<1x128xf32, #tpu.memory_space<vmem>>, vector<1x128xf32>
    %34 = vector.broadcast %33 : vector<1x128xf32> to vector<8x128xf32>
    %35 = arith.addf %32, %34 : vector<8x128xf32>
    %36 = arith.truncf %35 : vector<8x128xf32> to vector<8x128xbf16>
    %37 = arith.negf %36 : vector<8x128xbf16>
    %38 = math.exp %37 : vector<8x128xbf16>
    %cst_20 = arith.constant 1.000000e+00 : bf16
    %39 = vector.broadcast %cst_20 : bf16 to vector<8x128xbf16>
    %40 = arith.addf %39, %38 : vector<8x128xbf16>
    %41 = arith.divf %39, %40 : vector<8x128xbf16>
    %42 = arith.mulf %36, %41 : vector<8x128xbf16>
    %43 = arith.extf %42 : vector<8x128xbf16> to vector<8x128xf32>
    %c0_21 = arith.constant 0 : index
    %c0_22 = arith.constant 0 : index
    %44 = vector.load %arg9[%c0_21, %c0_22] : memref<1x128xf32, #tpu.memory_space<vmem>>, vector<1x128xf32>
    %45 = vector.broadcast %44 : vector<1x128xf32> to vector<8x128xf32>
    %46 = arith.mulf %43, %45 : vector<8x128xf32>
    %cst_23 = arith.constant dense<0.000000e+00> : vector<8xf32>
    %47 = vector.multi_reduction <add>, %46, %cst_23 [1] : vector<8x128xf32> to vector<8xf32>
    %48 = vector.shape_cast %47 : vector<8xf32> to vector<8x1xf32>
    %c0_24 = arith.constant 0 : index
    %c0_25 = arith.constant 0 : index
    %49 = memref.load %arg10[%c0_24, %c0_25] : memref<1x1xf32, #tpu.memory_space<smem>>
    %50 = vector.broadcast %49 : f32 to vector<8x1xf32>
    %51 = arith.addf %48, %50 : vector<8x1xf32>
    %c0_26 = arith.constant 0 : index
    %c0_27 = arith.constant 0 : index
    %52 = vector.load %arg11[%c0_26, %c0_27] : memref<8x1xf32, #tpu.memory_space<vmem>>, vector<8x1xf32>
    tpu.vector_store %arg11[%c0_26, %c0_27], %51 {strides = array<i32>} : memref<8x1xf32, #tpu.memory_space<vmem>>, vector<8x1xf32>,
    return
  }
  func.func @transform_0(%arg0: i32) -> (i32, i32) {
    %c0_i32 = arith.constant 0 : i32
    %c0_i32_0 = arith.constant 0 : i32
    return %arg0, %c0_i32 : i32, i32
  }
  func.func @transform_1(%arg0: i32) -> (i32, i32) {
    %c0_i32 = arith.constant 0 : i32
    %c0_i32_0 = arith.constant 0 : i32
    %c0_i32_1 = arith.constant 0 : i32
    return %c0_i32, %c0_i32_0 : i32, i32
  }
  func.func @transform_2(%arg0: i32) -> (i32, i32) {
    %c0_i32 = arith.constant 0 : i32
    %c0_i32_0 = arith.constant 0 : i32
    %c0_i32_1 = arith.constant 0 : i32
    return %c0_i32, %c0_i32_0 : i32, i32
  }
  func.func @transform_3(%arg0: i32) -> (i32, i32) {
    %c0_i32 = arith.constant 0 : i32
    %c0_i32_0 = arith.constant 0 : i32
    %c0_i32_1 = arith.constant 0 : i32
    return %c0_i32, %c0_i32_0 : i32, i32
  }
  func.func @transform_4(%arg0: i32) -> (i32, i32) {
    %c0_i32 = arith.constant 0 : i32
    %c0_i32_0 = arith.constant 0 : i32
    %c0_i32_1 = arith.constant 0 : i32
    return %c0_i32, %c0_i32_0 : i32, i32
  }
  func.func @transform_5(%arg0: i32) -> (i32, i32) {
    %c0_i32 = arith.constant 0 : i32
    %c0_i32_0 = arith.constant 0 : i32
    %c0_i32_1 = arith.constant 0 : i32
    return %c0_i32, %c0_i32_0 : i32, i32
  }
  func.func @transform_6(%arg0: i32) -> (i32, i32) {
    %c0_i32 = arith.constant 0 : i32
    %c0_i32_0 = arith.constant 0 : i32
    %c0_i32_1 = arith.constant 0 : i32
    return %c0_i32, %c0_i32_0 : i32, i32
  }
  func.func @transform_7(%arg0: i32) -> (i32, i32) {
    %c0_i32 = arith.constant 0 : i32
    %c0_i32_0 = arith.constant 0 : i32
    %c0_i32_1 = arith.constant 0 : i32
    return %c0_i32, %c0_i32_0 : i32, i32
  }
  func.func @transform_8(%arg0: i32) -> (i32, i32) {
    %c0_i32 = arith.constant 0 : i32
    %c0_i32_0 = arith.constant 0 : i32
    %c0_i32_1 = arith.constant 0 : i32
    return %c0_i32, %c0_i32_0 : i32, i32
  }
  func.func @transform_9(%arg0: i32) -> (i32, i32) {
    %c0_i32 = arith.constant 0 : i32
    %c0_i32_0 = arith.constant 0 : i32
    %c0_i32_1 = arith.constant 0 : i32
    return %c0_i32, %c0_i32_0 : i32, i32
  }
  func.func @transform_10(%arg0: i32) -> (i32, i32) {
    %c0_i32 = arith.constant 0 : i32
    %c0_i32_0 = arith.constant 0 : i32
    return %arg0, %c0_i32 : i32, i32
  }
}

</mosaic_0001>

<bundles_post_ra>
// kernel: tpu_custom_call.1
= control target key start
LH: loop header
LB: loop body
LE: loop exit
PB: predicated region body
PF: predicated region fallthrough
CT: control target
= control target key end

     0   :  { %16 = vsyncpa [#allocation4], 0  ;;  %s1248_s0 = inlined_call_operand.hbm [shape: f32[8,40], index: 0, kind: input, shape index: {}]   ;;  %s1249_s1 = inlined_call_operand.hbm [shape: bf16[40,384], index: 1, kind: input, shape index: {}]   ;;  %s1250_s2 = inlined_call_operand.vmem [shape: f32[1,384], index: 2, kind: input, shape index: {}]   ;;  %s1251_s3 = inlined_call_operand.hbm [shape: bf16[256,128], index: 3, kind: input, shape index: {}]   ;;  %s1252_s4 = inlined_call_operand.vmem [shape: f32[1,128], index: 4, kind: input, shape index: {}]   ;;  %s1253_s5 = inlined_call_operand.hbm [shape: bf16[128,128], index: 5, kind: input, shape index: {}]   ;;  %s1254_s6 = inlined_call_operand.hbm [shape: bf16[128,128], index: 6, kind: input, shape index: {}]   ;;  %s1255_s7 = inlined_call_operand.vmem [shape: f32[1,128], index: 7, kind: input, shape index: {}]   ;;  %s1256_s8 = inlined_call_operand.vmem [shape: f32[1,128], index: 8, kind: input, shape index: {}]   ;;  %s1257_s9 = inlined_call_operand.<no memory space> [shape: f32[1,1], index: 9, kind: input, shape index: {}]   ;;  %s1258_s10 = inlined_call_operand.vmem [shape: f32[8,1], index: 10, kind: output, shape index: {}]  }
   0x1   :  { %17 = vsyncpa [#allocation6], 0 }
   0x2   :  { %18 = vsyncpa [#allocation9], 0  ;;  %s1064_s13 = smov [#allocation5]   ;;  %s948_s17 = scalar_lea.hbm %s1249_s1, 960 }
   0x3   :  { %s34_s14 = sshll.u32 %s1064_s13, 4  ;;  %p949_p0 = scmp.ne.s32.totalorder %s1249_s1, %s948_s17  ;;  %s35_s14 = int_to_ptr.vmem [resolvable:$true] %s34_s14 }
   0x4   :  { %p952_p1 = scmp.lt.u32.totalorder %s948_s17, %s1249_s1 }
   0x6   :  { %p954_p2 = pnand %p952_p1, %p949_p0 }
   0x8   :  { %957 = shalt.err (!%p954_p2)
}
   0x9   :  { %s958_s22 = scalar_lea.vmem %s35_s14, 960  ;;  %p963_p4 = scmp.lt.s32.totalorder %s35_s14, %s35_s14 }
   0xa   :  { %p959_p3 = scmp.ne.s32.totalorder %s35_s14, %s958_s22  ;;  %p964_p5 = scmp.lt.s32.totalorder %s958_s22, %s958_s22 }
   0xc   :  { %p965_p6 = por %p964_p5, %p963_p4 }
   0xe   :  { %p966_p7 = pnand %p965_p6, %p959_p3 }
  0x10   :  { %969 = shalt.err (!%p966_p7)
}
  0x11   :  { %s1065_s23 = smov 192   ;;  %s1066_s24 = smov 12  }
  0x12   :  { %40 = dma.hbm_to_vmem [thread:$0]  %s1249_s1, 960, %s35_s14, [#allocation6], %s1065_s23, %s1065_s23, %s1066_s24  }
  0x13   :  { %s1067_s27 = smov [#allocation8]   ;;  %s1068_s29 = smov [#allocation3]  }
  0x14   :  { %s62_s28 = sshll.u32 %s1067_s27, 4  ;;  %s25_s30 = sshll.u32 %s1068_s29, 4  ;;  %s63_s28 = int_to_ptr.vmem [resolvable:$true] %s62_s28  ;;  %s26_s30 = int_to_ptr.vmem [resolvable:$true] %s25_s30 }
  0x15   :  { %s970_s13 = scalar_lea.hbm %s1253_s5, 1024 }
  0x16   :  { %p971_p8 = scmp.ne.s32.totalorder %s1253_s5, %s970_s13  ;;  %p974_p9 = scmp.lt.u32.totalorder %s970_s13, %s1253_s5 }
  0x18   :  { %p976_p10 = pnand %p974_p9, %p971_p8 }
  0x1a   :  { %979 = shalt.err (!%p976_p10)
}
  0x1b   :  { %s980_s1 = scalar_lea.vmem %s63_s28, 1024  ;;  %p985_p12 = scmp.lt.s32.totalorder %s63_s28, %s63_s28 }
  0x1c   :  { %p981_p11 = scmp.ne.s32.totalorder %s63_s28, %s980_s1  ;;  %p986_p13 = scmp.lt.s32.totalorder %s980_s1, %s980_s1 }
  0x1e   :  { %p987_p0 = por %p986_p13, %p985_p12 }
  0x20   :  { %p988_p1 = pnand %p987_p0, %p981_p11 }
  0x22   :  { %991 = shalt.err (!%p988_p1)
}
  0x23   :  { %s1069_s14 = smov 64   ;;  %s1070_s19 = smov 4  }
  0x24   :  { %68 = dma.hbm_to_vmem [thread:$0]  %s1253_s5, 1024, %s63_s28, [#allocation9], %s1069_s14, %s1069_s14, %s1070_s19  }
  0x25   :  { %s992_s24 = scalar_lea.hbm %s1248_s0, 128 }
  0x26   :  { %p993_p2 = scmp.ne.s32.totalorder %s1248_s0, %s992_s24  ;;  %p996_p3 = scmp.lt.u32.totalorder %s992_s24, %s1248_s0 }
  0x28   :  { %p998_p4 = pnand %p996_p3, %p993_p2 }
  0x2a   :  { %1001 = shalt.err (!%p998_p4)
}
  0x2b   :  { %s1002_s11 = scalar_lea.vmem %s26_s30, 128  ;;  %p1007_p6 = scmp.lt.s32.totalorder %s26_s30, %s26_s30 }
  0x2c   :  { %p1003_p5 = scmp.ne.s32.totalorder %s26_s30, %s1002_s11  ;;  %p1008_p7 = scmp.lt.s32.totalorder %s1002_s11, %s1002_s11 }
  0x2e   :  { %p1009_p8 = por %p1008_p7, %p1007_p6 }
  0x30   :  { %p1010_p9 = pnand %p1009_p8, %p1003_p5 }
  0x32   :  { %1013 = shalt.err (!%p1010_p9)
}
  0x33   :  { %28 = dma.hbm_to_vmem [thread:$0]  %s1248_s0, 128, %s26_s30, [#allocation4]  }
  0x34   :  { %s1071_s12 = smov [#allocation7]   ;;  %s1072_s15 = smov [#allocation10]  }
  0x35   :  { %s48_s13 = sshll.u32 %s1071_s12, 4  ;;  %s74_s16 = sshll.u32 %s1072_s15, 4  ;;  %s49_s13 = int_to_ptr.vmem [resolvable:$true] %s48_s13  ;;  %s75_s16 = int_to_ptr.vmem [resolvable:$true] %s74_s16 }
  0x36   :  { %s1014_s1 = scalar_lea.hbm %s1251_s3, 2048 }
  0x37   :  { %p1015_p10 = scmp.ne.s32.totalorder %s1251_s3, %s1014_s1  ;;  %p1018_p11 = scmp.lt.u32.totalorder %s1014_s1, %s1251_s3 }
  0x39   :  { %p1020_p12 = pnand %p1018_p11, %p1015_p10 }
  0x3b   :  { %1023 = shalt.err (!%p1020_p12)
}
  0x3c   :  { %s1024_s0 = scalar_lea.vmem %s49_s13, 2048  ;;  %p1029_p0 = scmp.lt.s32.totalorder %s49_s13, %s49_s13 }
  0x3d   :  { %p1025_p13 = scmp.ne.s32.totalorder %s49_s13, %s1024_s0  ;;  %p1030_p1 = scmp.lt.s32.totalorder %s1024_s0, %s1024_s0 }
  0x3f   :  { %p1031_p2 = por %p1030_p1, %p1029_p0 }
  0x41   :  { %p1032_p3 = pnand %p1031_p2, %p1025_p13 }
  0x43   :  { %1035 = shalt.err (!%p1032_p3)
}
  0x44   :  { %54 = dma.hbm_to_vmem [thread:$0]  %s1251_s3, 2048, %s49_s13, [#allocation6], %s1069_s14, %s1069_s14, %s1070_s19  }
  0x45   :  { %s1036_s27 = scalar_lea.hbm %s1254_s6, 1024 }
  0x46   :  { %p1037_p4 = scmp.ne.s32.totalorder %s1254_s6, %s1036_s27  ;;  %p1040_p5 = scmp.lt.u32.totalorder %s1036_s27, %s1254_s6 }
  0x48   :  { %p1042_p6 = pnand %p1040_p5, %p1037_p4 }
  0x4a   :  { %1045 = shalt.err (!%p1042_p6)
}
  0x4b   :  { %s1046_s12 = scalar_lea.vmem %s75_s16, 1024  ;;  %p1051_p8 = scmp.lt.s32.totalorder %s75_s16, %s75_s16 }
  0x4c   :  { %p1047_p7 = scmp.ne.s32.totalorder %s75_s16, %s1046_s12  ;;  %p1052_p9 = scmp.lt.s32.totalorder %s1046_s12, %s1046_s12 }
  0x4e   :  { %p1053_p10 = por %p1052_p9, %p1051_p8 }
  0x50   :  { %p1054_p11 = pnand %p1053_p10, %p1047_p7 }
  0x52   :  { %1057 = shalt.err (!%p1054_p11)
}
  0x53   :  { %80 = dma.hbm_to_vmem [thread:$0]  %s1254_s6, 1024, %s75_s16, [#allocation9], %s1069_s14, %s1069_s14, %s1070_s19  }
  0x54   :  { %1058 = dma.done.wait [#allocation4], 128  }
  0x55   :  { %1059 = vsyncadd [#allocation4], 4294967168 }
  0x56   :  { %1060 = dma.done.wait [#allocation6], 3008  }
  0x57   :  { %1061 = vsyncadd [#allocation6], 4294964288 }
  0x58   :  { %1062 = dma.done.wait [#allocation9], 2048  }
  0x59   :  { %1063 = vsyncadd [#allocation9], 4294965248  ;;  %v1073_v0 = vmov 0   ;;  %v885_v1 = vld [vmem:[#allocation5 + $0x4] ss:$12 sps:$4 sm:$0xff]   ;;  %vm177_vm0 = vcmask 1043456   ;;  %v118_v32 = vlaneseq }
  0x5a   :  { %219 = vmatprep.mubr.bf16.mxu1 %v1073_v0  ;;  %v887_v2 = vld [vmem:[#allocation5] ss:$12 sps:$4 sm:$0xff]   ;;  %187 = vmatprep.subr.bf16.mxu1 %v885_v1  ;;  %v888_v3 = vld [vmem:[#allocation5 + $0x1c] ss:$12 sps:$4 sm:$0xff]   ;;  %v114_v4 = vld [vmem:[#allocation5 + $0x30] sm:$0xff]  ;;  %vm173_vm1 = vcmask 326656  }
  0x5b   :  { %188 = vmatpush1.bf16.msra.mxu1 %v887_v2  ;;  %v890_v5 = vld [vmem:[#allocation5 + $0x18] ss:$12 sps:$4 sm:$0xff]   ;;  %v733_v6 = vcombine.low %v114_v4, %v114_v4  ;;  %v734_v7 = vcombine.high %v114_v4, %v114_v4  ;;  %v893_v10 = vld [vmem:[#allocation5 + $0x8] ss:$12 sps:$4 sm:$0xff]   ;;  %v1074_v12 = vmov 0.0   ;;  %v896_v16 = vld [vmem:[#allocation7 + $0x40] sm:$0xff]  }
  0x5c   :  { %189 = vmatprep.subr.bf16.mxu1 %v888_v3  ;;  %v104_v9 = vld [vmem:[#allocation3] sm:$0xff]  ;;  %v894_v13 = vld [vmem:[#allocation5 + $0x20] ss:$12 sps:$4 sm:$0xff]   ;;  %783 = vmatprep.subr.bf16.mxu0 %v896_v16  ;;  %vm1075_vm2 = vmmov 0   ;;  %v898_v18 = vld [vmem:[#allocation7 + $0x48] sm:$0xff]   ;;  %v119_v33 = vshrl.u32 %v118_v32, 7 }
  0x5d   :  { %v179_v8 = vsel %vm177_vm0, %v733_v6, 0  ;;  %v105_v11 = vpack.c.bf16 %v104_v9, %v104_v9  ;;  %v895_v14 = vld [vmem:[#allocation5 + $0x38] ss:$0 sps:$4 sm:$0xff]   ;;  %v897_v17 = vld [vmem:[#allocation7] sm:$0xff]   ;;  %v899_v19 = vld [vmem:[#allocation7 + $0x8] sm:$0xff]   ;;  %vm718_vm3 = vcmask 7168  }
  0x5e   :  { %v185_v15 = vsel %vm177_vm0, %v895_v14, 0  ;;  %784 = vmatpush3.bf16.msra.mxu0 %v897_v17  ;;  %v900_v20 = vld [vmem:[#allocation7 + $0x50] sm:$0xff]   ;;  %v902_v22 = vld [vmem:[#allocation7 + $0x58] sm:$0xff]   ;;  %v904_v24 = vld [vmem:[#allocation7 + $0x60] sm:$0xff]   ;;  %v120_v34 = vsub.s32 0, %v119_v33  ;;  %v124_v36 = vsub.s32 1, %v119_v33 }
  0x5f   :  { %190 = vmatpush1.bf16.msra.mxu1 %v890_v5  ;;  %785 = vmatprep.subr.bf16.mxu0 %v898_v18  ;;  %v901_v21 = vld [vmem:[#allocation7 + $0x10] sm:$0xff]   ;;  %v903_v23 = vld [vmem:[#allocation7 + $0x18] sm:$0xff]   ;;  %v905_v25 = vld [vmem:[#allocation7 + $0x20] sm:$0xff]   ;;  %v128_v1 = vsub.s32 2, %v119_v33 }
  0x60   :  { %736 = vmatprep.subr.msk.bf16.mxu1 %vm177_vm0, %v734_v7  ;;  %v906_v26 = vld [vmem:[#allocation7 + $0x68] sm:$0xff]   ;;  %v908_v28 = vld [vmem:[#allocation7 + $0x70] sm:$0xff]   ;;  %v910_v30 = vld [vmem:[#allocation7 + $0x78] sm:$0xff]  }
  0x61   :  { %v907_v27 = vld [vmem:[#allocation7 + $0x28] sm:$0xff]   ;;  %v909_v29 = vld [vmem:[#allocation7 + $0x30] sm:$0xff]   ;;  %v911_v31 = vld [vmem:[#allocation7 + $0x38] sm:$0xff]  }
  0x62   :  { %786 = vmatpush3.bf16.msra.mxu0 %v899_v19  ;;  %v116_v35 = vld [vmem:[%s1250_s2] sm:$0x7]  ;;  %v912_v39 = vld [vmem:[#allocation10] sm:$0xff]   ;;  %v913_v43 = vld [vmem:[#allocation10 + $0x8] sm:$0xff]  }
  0x63   :  { %192 = vmatpush1.bf16.msra.mxu1 %v179_v8  ;;  %787 = vmatprep.subr.bf16.mxu0 %v900_v20  ;;  %v121_v37 = vrot.slane %v116_v35, %v120_v34  ;;  %v125_v38 = vrot.slane %v116_v35, %v124_v36  ;;  %v914_v50 = vld [vmem:[#allocation10 + $0x10] sm:$0xff]   ;;  %v915_v52 = vld [vmem:[#allocation10 + $0x18] sm:$0xff]   ;;  %v916_v53 = vld [vmem:[#allocation10 + $0x20] sm:$0xff]   ;;  %v129_v2 = vrot.slane %v116_v35, %v128_v1 }
  0x64   :  { %823 = vmatprep.subr.bf16.mxu1 %v1074_v12  ;;  %v917_v54 = vld [vmem:[#allocation10 + $0x28] sm:$0xff]   ;;  %v920_v18 = vld [vmem:[#allocation8] sm:$0xff]   ;;  %v922_v20 = vld [vmem:[#allocation8 + $0x10] sm:$0xff]  }
  0x65   :  { %v921_v19 = vld [vmem:[#allocation8 + $0x8] sm:$0xff]  }
  0x66   :  { %737 = vmatmul.mubr.msk.bf16.vlgmr.msra.gmra.mrb[0].mxu1 %vm173_vm1, %v105_v11  ;;  %788 = vmatpush3.bf16.msra.mxu0 %v901_v21  ;;  %v923_v21 = vld [vmem:[#allocation8 + $0x18] sm:$0xff]  }
  0x67   :  { %824 = vmatpush3.bf16.msra.mxu1 %v893_v10  ;;  %829 = vmatprep.mubr.msk.bf16.mxu1 %vm1075_vm2, %v1074_v12 }
  0x68   :  { %825 = vmatprep.subr.bf16.mxu1 %v1074_v12  ;;  %789 = vmatprep.subr.bf16.mxu0 %v902_v22  ;;  %v924_v22 = vld [vmem:[#allocation8 + $0x20] sm:$0xff]  }
  0x6a   :  { %790 = vmatpush3.bf16.msra.mxu0 %v903_v23  ;;  %v925_v23 = vld [vmem:[#allocation8 + $0x28] sm:$0xff]  }
  0x6b   :  { %826 = vmatpush3.bf16.msra.mxu1 %v894_v13  ;;  %791 = vmatprep.subr.bf16.mxu0 %v904_v24  ;;  %v918_v13 = vld [vmem:[#allocation10 + $0x30] sm:$0xff]  }
  0x6c   :  { %827 = vmatprep.subr.bf16.mxu1 %v1074_v12  ;;  %v926_v24 = vld [vmem:[#allocation8 + $0x30] sm:$0xff]  }
  0x6e   :  { %792 = vmatpush3.bf16.msra.mxu0 %v905_v25  ;;  %v927_v25 = vld [vmem:[#allocation8 + $0x38] sm:$0xff]  }
  0x6f   :  { %828 = vmatpush3.bf16.msra.mxu1 %v185_v15  ;;  %793 = vmatprep.subr.bf16.mxu0 %v906_v26  ;;  %v919_v15 = vld [vmem:[#allocation10 + $0x38] sm:$0xff]  }
  0x70   :  { %833 = vmatprep.subr.bf16.mxu1 %v1074_v12 }
  0x72   :  { %830 = vmatmul.mubr.msk.bf16.vlgmr.msra.gmra.mrb[4].mxu1 %vm173_vm1, %v105_v11  ;;  %794 = vmatpush3.bf16.msra.mxu0 %v907_v27  ;;  %v742_v27 = vld [vmem:[%s1252_s4] ss:$0 sm:$0xff] }
  0x73   :  { %849 = vmatprep.mubr.msk.bf16.mxu1 %vm1075_vm2, %v1074_v12  ;;  %795 = vmatprep.subr.bf16.mxu0 %v908_v28 }
  0x74   :  { %834 = vmatpush3.bf16.msra.mxu1 %v912_v39 }
  0x75   :  { %835 = vmatprep.subr.bf16.mxu1 %v1074_v12 }
  0x76   :  { %796 = vmatpush3.bf16.msra.mxu0 %v909_v29 }
  0x77   :  { %797 = vmatprep.subr.bf16.mxu0 %v910_v30 }
  0x78   :  { %836 = vmatpush3.bf16.msra.mxu1 %v913_v43 }
  0x79   :  { %837 = vmatprep.subr.bf16.mxu1 %v1074_v12 }
  0x7a   :  { %798 = vmatpush3.bf16.msra.mxu0 %v911_v31 }
  0x7b   :  { %853 = vmatprep.subr.bf16.mxu0 %v1074_v12 }
  0x7c   :  { %838 = vmatpush3.bf16.msra.mxu1 %v914_v50 }
  0x7d   :  { %839 = vmatprep.subr.bf16.mxu1 %v1074_v12 }
  0x80   :  { %840 = vmatpush3.bf16.msra.mxu1 %v915_v52 }
  0x81   :  { %841 = vmatprep.subr.bf16.mxu1 %v1074_v12 }
  0x84   :  { %842 = vmatpush3.bf16.msra.mxu1 %v916_v53 }
  0x85   :  { %843 = vmatprep.subr.bf16.mxu1 %v1074_v12 }
  0x88   :  { %844 = vmatpush3.bf16.msra.mxu1 %v917_v54 }
  0x89   :  { %845 = vmatprep.subr.bf16.mxu1 %v1074_v12 }
  0x8c   :  { %846 = vmatpush3.bf16.msra.mxu1 %v918_v13 }
  0x8d   :  { %847 = vmatprep.subr.bf16.mxu1 %v1074_v12 }
  0x90   :  { %848 = vmatpush3.bf16.msra.mxu1 %v919_v15 }
 0x139   :  { %v221_v40 = vpop.f32.mrb[0].mxu1 }
 0x13a   :  { %v222_v41 = vadd.f32 %v221_v40, %v121_v37  ;;  %v223_v42 = vpop.f32.mrb[1].mxu1 }
 0x13b   :  { %v224_v44 = vadd.f32 %v223_v42, %v125_v38  ;;  %v225_v45 = vpop.f32.mrb[2].mxu1 }
 0x13c   :  { %v268_v46 = vpack.c.bf16 %v222_v41, %v222_v41  ;;  %v226_v47 = vpop.f32.mrb[3].mxu1 }
 0x13d   :  { %v269_v48 = vpack.c.bf16 %v224_v44, %v224_v44  ;;  %v776_v44 = vld [vmem:[%s1255_s7] ss:$0 sm:$0xff] }
 0x13e   :  { %v739_v49 = vmul.bf16 3216621497, %v268_v46 }
 0x13f   :  { %v740_v51 = vmul.bf16 3216621497, %v269_v48 }
 0x140   :  { %928 = vpow.bf16 %v739_v49 }
 0x141   :  { %930 = vpow.bf16 %v740_v51 }
 0x145   :  { %v262_v3 = vpop.f32.mrb[4].mxu1 }
 0x146   :  { %v263_v4 = vadd.f32 %v262_v3, %v129_v2  ;;  %v831_v5 = vpop.f32.mrb[5].mxu1 }
 0x147   :  { %v265_v6 = vpop.f32.mrb[6].mxu1 }
 0x148   :  { %v270_v7 = vpack.c.bf16 %v263_v4, %v263_v4  ;;  %v832_v8 = vpop.f32.mrb[7].mxu1 }
 0x14a   :  { %v741_v9 = vmul.bf16 3216621497, %v270_v7 }
 0x14b   :  { %v929_v55 = vpop.eup %928 }
 0x14c   :  { %v931_v56 = vpop.eup %930  ;;  %v283_v57 = vadd.bf16 1065369472, %v929_v55 }
 0x14d   :  { %v284_v58 = vadd.bf16 1065369472, %v931_v56 }
 0x14e   :  { %932 = vrcp.bf16 %v283_v57  ;;  %v778_v57 = vld [vmem:[%s1256_s8] ss:$0 sm:$0xff] }
 0x14f   :  { %934 = vrcp.bf16 %v284_v58 }
 0x150   :  { %936 = vpow.bf16 %v741_v9 }
 0x159   :  { %v933_v59 = vpop.eup %932 }
 0x15a   :  { %v935_v60 = vpop.eup %934  ;;  %v287_v61 = vmul.bf16 1065369472, %v933_v59 }
 0x15b   :  { %v289_v62 = vmul.bf16 1065369472, %v935_v60  ;;  %v937_v10 = vpop.eup %936  ;;  %v716_v60 = vstv %s1257_s9 }
 0x15c   :  { %v292_v0 = vmul.bf16 %v287_v61, %v268_v46  ;;  %v285_v11 = vadd.bf16 1065369472, %v937_v10 }
 0x15d   :  { %v293_v63 = vmul.bf16 %v289_v62, %v269_v48 }
 0x15e   :  { %938 = vrcp.bf16 %v285_v11 }
 0x15f   :  { %462 = vmatprep.mubr.bf16.mxu0 %v293_v63 }
 0x160   :  { %463 = vmatmul.mubr.bf16.vlgmr.msra.gmra.mrb[0].mxu0 %v292_v0 }
 0x161   :  { %869 = vmatprep.mubr.msk.bf16.mxu0 %vm1075_vm2, %v1074_v12  ;;  %854 = vmatpush3.bf16.msra.mxu0 %v920_v18 }
 0x162   :  { %855 = vmatprep.subr.bf16.mxu0 %v1074_v12 }
 0x165   :  { %856 = vmatpush3.bf16.msra.mxu0 %v921_v19 }
 0x166   :  { %857 = vmatprep.subr.bf16.mxu0 %v1074_v12 }
 0x169   :  { %v939_v14 = vpop.eup %938  ;;  %858 = vmatpush3.bf16.msra.mxu0 %v922_v20 }
 0x16a   :  { %v291_v16 = vmul.bf16 1065369472, %v939_v14  ;;  %859 = vmatprep.subr.bf16.mxu0 %v1074_v12 }
 0x16c   :  { %v294_v17 = vmul.bf16 %v291_v16, %v270_v7 }
 0x16d   :  { %860 = vmatpush3.bf16.msra.mxu0 %v923_v21 }
 0x16e   :  { %850 = vmatmul.mubr.bf16.vlgmr.msra.gmra.mrb[8].mxu1 %v294_v17  ;;  %861 = vmatprep.subr.bf16.mxu0 %v1074_v12 }
 0x171   :  { %862 = vmatpush3.bf16.msra.mxu0 %v924_v22 }
 0x172   :  { %863 = vmatprep.subr.bf16.mxu0 %v1074_v12 }
 0x175   :  { %864 = vmatpush3.bf16.msra.mxu0 %v925_v23 }
 0x176   :  { %865 = vmatprep.subr.bf16.mxu0 %v1074_v12 }
 0x179   :  { %866 = vmatpush3.bf16.msra.mxu0 %v926_v24 }
 0x17a   :  { %867 = vmatprep.subr.bf16.mxu0 %v1074_v12 }
 0x17d   :  { %868 = vmatpush3.bf16.msra.mxu0 %v927_v25 }
 0x233   :  { %v799_v26 = vpop.f32.mrb[0].mxu0 }
 0x234   :  { %v800_v28 = vpop.f32.mrb[1].mxu0 }
 0x235   :  { %v801_v29 = vadd.f32 %v800_v28, %v799_v26  ;;  %v802_v30 = vpop.f32.mrb[2].mxu0 }
 0x236   :  { %v803_v31 = vpop.f32.mrb[3].mxu0 }
 0x237   :  { %v465_v32 = vadd.f32 %v801_v29, %v742_v27 }
 0x239   :  { %v470_v33 = vpack.c.bf16 %v465_v32, %v465_v32 }
 0x23b   :  { %v759_v34 = vmul.bf16 3216621497, %v470_v33 }
 0x23d   :  { %940 = vpow.bf16 %v759_v34 }
 0x241   :  { %v593_v39 = vpop.f32.mrb[8].mxu1 }
 0x242   :  { %v851_v40 = vpop.f32.mrb[9].mxu1 }
 0x243   :  { %v596_v41 = vpop.f32.mrb[10].mxu1 }
 0x244   :  { %v852_v42 = vpop.f32.mrb[11].mxu1 }
 0x248   :  { %v941_v35 = vpop.eup %940 }
 0x249   :  { %v475_v36 = vadd.bf16 1065369472, %v941_v35 }
 0x24b   :  { %942 = vrcp.bf16 %v475_v36 }
 0x256   :  { %v943_v37 = vpop.eup %942 }
 0x257   :  { %v477_v12 = vmul.bf16 1065369472, %v943_v37 }
 0x259   :  { %v478_v38 = vmul.bf16 %v477_v12, %v470_v33 }
 0x25b   :  { %870 = vmatmul.mubr.bf16.vlgmr.msra.gmra.mrb[4].mxu0 %v478_v38 }
 0x32e   :  { %v681_v43 = vpop.f32.mrb[4].mxu0 }
 0x32f   :  { %v682_v45 = vadd.f32 %v681_v43, %v593_v39  ;;  %v871_v46 = vpop.f32.mrb[5].mxu0 }
 0x330   :  { %v684_v47 = vpop.f32.mrb[6].mxu0 }
 0x331   :  { %v694_v48 = vadd.f32 %v776_v44, %v682_v45  ;;  %v872_v49 = vpop.f32.mrb[7].mxu0 }
 0x333   :  { %v695_v50 = vpack.c.bf16 %v694_v48, %v694_v48 }
 0x335   :  { %v777_v51 = vmul.bf16 3216621497, %v695_v50 }
 0x337   :  { %944 = vpow.bf16 %v777_v51 }
 0x342   :  { %v945_v52 = vpop.eup %944 }
 0x343   :  { %v700_v53 = vadd.bf16 1065369472, %v945_v52 }
 0x345   :  { %946 = vrcp.bf16 %v700_v53 }
 0x350   :  { %v947_v54 = vpop.eup %946 }
 0x351   :  { %v702_v55 = vmul.bf16 1065369472, %v947_v54 }
 0x353   :  { %v703_v56 = vmul.bf16 %v702_v55, %v695_v50 }
 0x355   :  { %v704_v58 = vunpack.c.l.bf16 %v703_v56 }
 0x357   :  { %v712_v59 = vmul.f32 %v778_v57, %v704_v58 }
 0x359   :  { %713 = vadd.xlane.f32.xlu0 %v712_v59 }
 0x3e6   :  { %v714_v61 = vpop.xlane.xlu0 %713 }
 0x3e7   :  { %v717_v62 = vadd.f32 %v716_v60, %v714_v61 }
 0x3e9   :  { %719 = vst.msk [vmem:[%s1258_s10] sm:$0xff] %vm718_vm3, %v717_v62 }
 0x3ea   :  { %724 = vsyncpa [#allocation4], 1 }
 0x3eb   :  { %725 = vsyncpa [#allocation6], 1 }
 0x3ec   :  { %726 = vsyncpa [#allocation9], 1 }

</bundles_post_ra>
